<compile_context>
chip_gen: v7x
topology: tpu7x:2x2x1
jax: 0.10.0
libtpu: 0.0.40
codegen_flags: <defaults>
</compile_context>

<pallas_src>
import functools

import jax
import jax.numpy as jnp
from jax.experimental import pallas as pl
from jax.experimental.pallas import tpu as pltpu

INPUT_DIM = 20
HIDDEN_DIM = 16


def _xavier_uniform(key, shape):
    # shape = (out_features, in_features), matching nn.Linear.weight
    fan_out, fan_in = shape
    bound = (6.0 / (fan_in + fan_out)) ** 0.5
    return jax.random.uniform(key, shape, jnp.float32, -bound, bound)


def _round_up(n, m):
    return ((n + m - 1) // m) * m


def fuse_autoencoder_params(w_enc, b_enc, w_dec, b_dec):
    """Fold the two bias-only Linear layers into one GEMM. Call ONCE at setup."""
    w_fused = jnp.asarray(w_enc).T @ jnp.asarray(w_dec).T            # (Fin, Fout)
    b_fused = (jnp.asarray(b_enc) @ jnp.asarray(w_dec).T
               + jnp.asarray(b_dec))[None, :]                        # (1, Fout)
    return w_fused, b_fused


def fused_autoencoder_kernel(x_ref, w_ref, b_ref, o_ref):
    # Single fused GEMM per tile: y = x @ W_fused + b_fused (no activation).
    y = jnp.dot(x_ref[...], w_ref[...], preferred_element_type=jnp.float32)
    o_ref[...] = (y + b_ref[...]).astype(o_ref.dtype)


@functools.partial(jax.jit, static_argnames=("tile_m",))
def autoencoder_forward_fused(x, w_fused, b_fused, *, tile_m=1024):
    """x: (B, Fin) f32. w_fused: (Fin, Fout). b_fused: (1, Fout)."""
    B, Fin = x.shape
    Fout = w_fused.shape[1]

    # Pad batch only to the sublane granularity (8): at most 7 wasted rows.
    B8 = _round_up(max(B, 8), 8)

    # Big tiles to amortize per-step overhead, but at least 2 roughly balanced
    # grid steps when possible so both v7x TensorCores get work.
    tm = _round_up(min(tile_m, B8), 8)
    if B8 >= 16:
        tm = min(tm, _round_up(pl.cdiv(B8, 2), 8))
    grid_m = pl.cdiv(B8, tm)

    if B8 != B:
        x = jnp.zeros((B8, Fin), x.dtype).at[:B, :].set(x)

    out = pl.pallas_call(
        fused_autoencoder_kernel,
        out_shape=jax.ShapeDtypeStruct((B8, Fout), x.dtype),
        grid_spec=pltpu.PrefetchScalarGridSpec(
            num_scalar_prefetch=0,
            grid=(grid_m,),
            in_specs=[
                pl.BlockSpec((tm, Fin), lambda i: (i, 0)),     # x tile (no lane pad)
                pl.BlockSpec((Fin, Fout), lambda i: (0, 0)),   # W_fused (constant block)
                pl.BlockSpec((1, Fout), lambda i: (0, 0)),     # b_fused (constant block)
            ],
            out_specs=pl.BlockSpec((tm, Fout), lambda i: (i, 0)),
        ),
        compiler_params=pltpu.CompilerParams(
            dimension_semantics=("parallel",)),
    )(x, w_fused, b_fused)

    return out if B8 == B else out[:B]


if __name__ == "__main__":
    key = jax.random.PRNGKey(0)
    k_x, k_enc, k_dec = jax.random.split(key, 3)

    # Deterministic parameter init mirroring initialize_weights():
    #   xavier_uniform_ on Linear weights, bias = 0.
    w_enc = _xavier_uniform(k_enc, (HIDDEN_DIM, INPUT_DIM))
    b_enc = jnp.zeros((HIDDEN_DIM,), jnp.float32)
    w_dec = _xavier_uniform(k_dec, (INPUT_DIM, HIDDEN_DIM))
    b_dec = jnp.zeros((INPUT_DIM,), jnp.float32)

    # Static weight fusion, done once.
    w_fused, b_fused = fuse_autoencoder_params(w_enc, b_enc, w_dec, b_dec)

    def reference(x):
        # Pure-JAX reference (unfused) -- fusion only reassociates f32 adds.
        return (x @ w_enc.T + b_enc) @ w_dec.T + b_dec

    # Main check: batch = 512 -> grid of 2 even tiles (both v7x TCs busy).
    batch = 512
    x = jax.random.normal(k_x, (batch, INPUT_DIM), jnp.float32)
    out = jax.block_until_ready(autoencoder_forward_fused(x, w_fused, b_fused))
    assert out.shape == (batch, INPUT_DIM)
    assert jnp.allclose(out, reference(x), atol=1e-4, rtol=1e-4)

    # Odd-batch check: exercises the pad-to-multiple-of-8 path.
    x_small = jax.random.normal(k_x, (13, INPUT_DIM), jnp.float32)
    out_small = jax.block_until_ready(
        autoencoder_forward_fused(x_small, w_fused, b_fused))
    assert out_small.shape == (13, INPUT_DIM)
    assert jnp.allclose(out_small, reference(x_small), atol=1e-4, rtol=1e-4)

    print("KERNEL_OK")
</pallas_src>

<mosaic_0001>
module attributes {stable_mosaic.version = 11 : i64} {
  func.func @fused_autoencoder_kernel(%arg0: i32, %arg1: memref<256x20xf32, #tpu.memory_space<vmem>>, %arg2: memref<20x20xf32, #tpu.memory_space<vmem>>, %arg3: memref<1x20xf32, #tpu.memory_space<vmem>>, %arg4: memref<256x20xf32, #tpu.memory_space<vmem>>) attributes {dimension_semantics = [#tpu.dimension_semantics<parallel>], iteration_bounds = array<i64: 2>, scalar_prefetch = 0 : i64, scratch_operands = 0 : i64, tpu.core_type = #tpu.core_type<tc>, window_params = [{transform_indices = @transform_0, window_bounds = array<i64: 256, 20>}, {pipeline_mode = #tpu.pipeline_mode<synchronous>, transform_indices = @transform_1, window_bounds = array<i64: 20, 20>}, {pipeline_mode = #tpu.pipeline_mode<synchronous>, transform_indices = @transform_2, window_bounds = array<i64: 1, 20>}, {transform_indices = @transform_3, window_bounds = array<i64: 256, 20>}]} {
    %c0 = arith.constant 0 : index
    %c0_0 = arith.constant 0 : index
    %0 = vector.load %arg1[%c0, %c0_0] : memref<256x20xf32, #tpu.memory_space<vmem>>, vector<256x20xf32>
    %c0_1 = arith.constant 0 : index
    %c0_2 = arith.constant 0 : index
    %1 = vector.load %arg2[%c0_1, %c0_2] : memref<20x20xf32, #tpu.memory_space<vmem>>, vector<20x20xf32>
    %cst = arith.constant dense<0.000000e+00> : vector<256x20xf32>
    %2 = tpu.matmul %0, %1, %cst {dimension_numbers = #tpu.dot_dimension_numbers<[1], [0], [0], [1], [0, 0, 1, 1], [], []>} : vector<256x20xf32>, vector<20x20xf32>, vector<256x20xf32> -> vector<256x20xf32>
    %c0_3 = arith.constant 0 : index
    %c0_4 = arith.constant 0 : index
    %3 = vector.load %arg3[%c0_3, %c0_4] : memref<1x20xf32, #tpu.memory_space<vmem>>, vector<1x20xf32>
    %4 = vector.broadcast %3 : vector<1x20xf32> to vector<256x20xf32>
    %5 = arith.addf %2, %4 : vector<256x20xf32>
    %c0_5 = arith.constant 0 : index
    %c0_6 = arith.constant 0 : index
    %6 = vector.load %arg4[%c0_5, %c0_6] : memref<256x20xf32, #tpu.memory_space<vmem>>, vector<256x20xf32>
    tpu.vector_store %arg4[%c0_5, %c0_6], %5 {strides = array<i32>} : memref<256x20xf32, #tpu.memory_space<vmem>>, vector<256x20xf32>,
    return
  }
  func.func @transform_0(%arg0: i32) -> (i32, i32) {
    %c0_i32 = arith.constant 0 : i32
    %c0_i32_0 = arith.constant 0 : i32
    return %arg0, %c0_i32 : i32, i32
  }
  func.func @transform_1(%arg0: i32) -> (i32, i32) {
    %c0_i32 = arith.constant 0 : i32
    %c0_i32_0 = arith.constant 0 : i32
    %c0_i32_1 = arith.constant 0 : i32
    return %c0_i32, %c0_i32_0 : i32, i32
  }
  func.func @transform_2(%arg0: i32) -> (i32, i32) {
    %c0_i32 = arith.constant 0 : i32
    %c0_i32_0 = arith.constant 0 : i32
    %c0_i32_1 = arith.constant 0 : i32
    return %c0_i32, %c0_i32_0 : i32, i32
  }
  func.func @transform_3(%arg0: i32) -> (i32, i32) {
    %c0_i32 = arith.constant 0 : i32
    %c0_i32_0 = arith.constant 0 : i32
    return %arg0, %c0_i32 : i32, i32
  }
}

</mosaic_0001>

<bundles_post_ra>
// kernel: autoencoder_forward_fused.1
= control target key start
LH: loop header
LB: loop body
LE: loop exit
PB: predicated region body
PF: predicated region fallthrough
CT: control target
= control target key end

     0   :  { %s808_s12 = smov 0   ;;  %s1010_s0 = inlined_call_operand.vmem [shape: f32[512,20], index: 0, kind: input, shape index: {}]   ;;  %s1011_s1 = inlined_call_operand.vmem [shape: f32[20,20], index: 1, kind: input, shape index: {}]   ;;  %s1012_s2 = inlined_call_operand.vmem [shape: f32[1,20], index: 2, kind: input, shape index: {}]   ;;  %s1013_s3 = inlined_call_operand.vmem [shape: f32[512,20], index: 3, kind: output, shape index: {}]  }
   0x1 LB: > { %s630_s13 = sadd.s32 4294967295, %s786_s12   ;;  %p634_p0 = scmp.ge.s32.totalorder %s786_s12, 1  ;;  %s786_s12 = sphi %s808_s12, %s13_s12  }
   0x2   : > { %p138_p1 = scmp.lt.s32.totalorder %s786_s12, 3 }
   0x4   : > { %p139_p2 = pnand %p634_p0, %p138_p1 }
   0x5   : > { %v206_v0 = vld [vmem:[%s1011_s1] sm:$0xff] (!%p139_p2)  ;;  %v207_v1 = vld [vmem:[%s1011_s1 + $0x8] sm:$0xff] (!%p139_p2)  ;;  %s635_s18 = sshll.u32 (!%p139_p2), %s630_s13, 5  ;;  %v208_v3 = vld [vmem:[%s1011_s1 + $0x10] sm:$0xf] (!%p139_p2)  ;;  %vm313_vm0 = vcmask (!%p139_p2), 1043456  }
   0x6   : > { %142 = sbr.rel (%p139_p2) target bundleno = 263 (0x107), region = 32  ;;  %v764_v2 = vpack.c.bf16 (!%p139_p2), %v207_v1, %v206_v0  ;;  %p163_p3 = scmp.lt.s32.totalorder (!%p139_p2), %s635_s18, 63  ;;  %vm216_vm1 = vcmask (!%p139_p2), 162816   ;;  %v902_v36 = vld [vmem:[%s1012_s2] ss:$0 sm:$0xff] (!%p139_p2) }
   0x8   : > { %765 = vmatprep.subr.bf16.mxu0 (!%p139_p2), %v764_v2  ;;  %768 = vmatprep.subr.bf16.mxu1 (!%p139_p2), %v764_v2 }
   0x9   : > { %767 = vmatpush3.bf16.msra.mxu0 (!%p139_p2), %v764_v2  ;;  %770 = vmatpush3.bf16.msra.mxu1 (!%p139_p2), %v764_v2 }
   0xa   : > { %714 = vmatprep.subr.msk.mxu0 (!%p139_p2), %vm313_vm0, %v208_v3  ;;  %769 = vmatprep.subr.msk.mxu1 (!%p139_p2), %vm313_vm0, %v208_v3 }
   0xd   : > { %s1015_s18 = smov (!%p163_p3, %s635_s18), 63  ;;  %715 = vmatpush3.msk.msra.mxu0 %vm313_vm0, %v208_v3  ;;  %771 = vmatpush3.msk.msra.mxu1 %vm313_vm0, %v208_v3 }
   0xe   : > { %s636_s21 = sshll.u32 %s1015_s18, 3 }
   0xf   : > { %s833_s24 = scalar_lea.vmem %s1010_s0, %s636_s21  ;;  %s909_s29 = scalar_lea.vmem %s1013_s3, %s636_s21 }
  0x10   : > { %v174_v4 = vld [vmem:[%s833_s24] sm:$0xff]  ;;  %v175_v6 = vld [vmem:[%s833_s24 + $0x8] sm:$0xff]  ;;  %v176_v8 = vld [vmem:[%s833_s24 + $0x10] sm:$0xff] }
  0x11   : > { %v190_v5 = vld [vmem:[%s833_s24 + $0x80] sm:$0xff]  ;;  %v191_v7 = vld [vmem:[%s833_s24 + $0x88] sm:$0xff]  ;;  %v192_v9 = vld [vmem:[%s833_s24 + $0x90] sm:$0xff]  ;;  %716 = vmatprep.mubr.msk.f32.mxu0 %vm216_vm1, %v174_v4 }
  0x12   : > { %740 = vmatprep.mubr.msk.f32.mxu1 %vm216_vm1, %v190_v5  ;;  %717 = vmatmul.mubr.msk.f32.vlgmr.msra.gmra.mrb[0].mxu0 %vm216_vm1, %v175_v6  ;;  %v177_v10 = vld [vmem:[%s833_s24 + $0x18] sm:$0xff]  ;;  %v178_v12 = vld [vmem:[%s833_s24 + $0x20] sm:$0xff]  ;;  %v179_v14 = vld [vmem:[%s833_s24 + $0x28] sm:$0xff] }
  0x13   : > { %741 = vmatmul.mubr.msk.f32.vlgmr.msra.gmra.mrb[0].mxu1 %vm216_vm1, %v191_v7  ;;  %719 = vmatprep.mubr.msk.f32.mxu0 %vm216_vm1, %v176_v8  ;;  %v193_v11 = vld [vmem:[%s833_s24 + $0x98] sm:$0xff]  ;;  %v194_v13 = vld [vmem:[%s833_s24 + $0xa0] sm:$0xff]  ;;  %v195_v15 = vld [vmem:[%s833_s24 + $0xa8] sm:$0xff] }
  0x14   : > { %743 = vmatprep.mubr.msk.f32.mxu1 %vm216_vm1, %v192_v9  ;;  %v180_v16 = vld [vmem:[%s833_s24 + $0x30] sm:$0xff]  ;;  %v181_v18 = vld [vmem:[%s833_s24 + $0x38] sm:$0xff]  ;;  %v182_v20 = vld [vmem:[%s833_s24 + $0x40] sm:$0xff] }
  0x15   : > { %v196_v17 = vld [vmem:[%s833_s24 + $0xb0] sm:$0xff]  ;;  %v197_v19 = vld [vmem:[%s833_s24 + $0xb8] sm:$0xff]  ;;  %v198_v21 = vld [vmem:[%s833_s24 + $0xc0] sm:$0xff] }
  0x16   : > { %720 = vmatmul.mubr.msk.f32.gmra.mrb[2].mxu0 %vm216_vm1, %v177_v10  ;;  %v183_v22 = vld [vmem:[%s833_s24 + $0x48] sm:$0xff]  ;;  %v184_v24 = vld [vmem:[%s833_s24 + $0x50] sm:$0xff]  ;;  %v185_v26 = vld [vmem:[%s833_s24 + $0x58] sm:$0xff] }
  0x17   : > { %744 = vmatmul.mubr.msk.f32.gmra.mrb[2].mxu1 %vm216_vm1, %v193_v11  ;;  %722 = vmatprep.mubr.msk.f32.mxu0 %vm216_vm1, %v178_v12  ;;  %v199_v23 = vld [vmem:[%s833_s24 + $0xc8] sm:$0xff]  ;;  %v200_v25 = vld [vmem:[%s833_s24 + $0xd0] sm:$0xff]  ;;  %v201_v27 = vld [vmem:[%s833_s24 + $0xd8] sm:$0xff] }
  0x18   : > { %746 = vmatprep.mubr.msk.f32.mxu1 %vm216_vm1, %v194_v13  ;;  %v186_v28 = vld [vmem:[%s833_s24 + $0x60] sm:$0xff]  ;;  %v187_v30 = vld [vmem:[%s833_s24 + $0x68] sm:$0xff]  ;;  %v188_v32 = vld [vmem:[%s833_s24 + $0x70] sm:$0xff] }
  0x19   : > { %v202_v29 = vld [vmem:[%s833_s24 + $0xe0] sm:$0xff]  ;;  %v203_v31 = vld [vmem:[%s833_s24 + $0xe8] sm:$0xff]  ;;  %v204_v33 = vld [vmem:[%s833_s24 + $0xf0] sm:$0xff] }
  0x1a   : > { %723 = vmatmul.mubr.msk.f32.gmra.mrb[4].mxu0 %vm216_vm1, %v179_v14  ;;  %v189_v34 = vld [vmem:[%s833_s24 + $0x78] sm:$0xff] }
  0x1b   : > { %747 = vmatmul.mubr.msk.f32.gmra.mrb[4].mxu1 %vm216_vm1, %v195_v15  ;;  %725 = vmatprep.mubr.msk.f32.mxu0 %vm216_vm1, %v180_v16  ;;  %v205_v35 = vld [vmem:[%s833_s24 + $0xf8] sm:$0xff] }
  0x1c   : > { %749 = vmatprep.mubr.msk.f32.mxu1 %vm216_vm1, %v196_v17 }
  0x1e   : > { %726 = vmatmul.mubr.msk.f32.gmra.mrb[6].mxu0 %vm216_vm1, %v181_v18 }
  0x1f   : > { %750 = vmatmul.mubr.msk.f32.gmra.mrb[6].mxu1 %vm216_vm1, %v197_v19  ;;  %728 = vmatprep.mubr.msk.f32.mxu0 %vm216_vm1, %v182_v20 }
  0x20   : > { %752 = vmatprep.mubr.msk.f32.mxu1 %vm216_vm1, %v198_v21 }
  0x22   : > { %729 = vmatmul.mubr.msk.f32.gmra.mrb[8].mxu0 %vm216_vm1, %v183_v22 }
  0x23   : > { %753 = vmatmul.mubr.msk.f32.gmra.mrb[8].mxu1 %vm216_vm1, %v199_v23  ;;  %731 = vmatprep.mubr.msk.f32.mxu0 %vm216_vm1, %v184_v24 }
  0x24   : > { %755 = vmatprep.mubr.msk.f32.mxu1 %vm216_vm1, %v200_v25 }
  0x26   : > { %732 = vmatmul.mubr.msk.f32.gmra.mrb[10].mxu0 %vm216_vm1, %v185_v26 }
  0x27   : > { %756 = vmatmul.mubr.msk.f32.gmra.mrb[10].mxu1 %vm216_vm1, %v201_v27  ;;  %734 = vmatprep.mubr.msk.f32.mxu0 %vm216_vm1, %v186_v28 }
  0x28   : > { %758 = vmatprep.mubr.msk.f32.mxu1 %vm216_vm1, %v202_v29 }
  0x2a   : > { %735 = vmatmul.mubr.msk.f32.gmra.mrb[12].mxu0 %vm216_vm1, %v187_v30 }
  0x2b   : > { %759 = vmatmul.mubr.msk.f32.gmra.mrb[12].mxu1 %vm216_vm1, %v203_v31  ;;  %737 = vmatprep.mubr.msk.f32.mxu0 %vm216_vm1, %v188_v32 }
  0x2c   : > { %761 = vmatprep.mubr.msk.f32.mxu1 %vm216_vm1, %v204_v33 }
  0x2e   : > { %738 = vmatmul.mubr.msk.f32.gmra.mrb[14].mxu0 %vm216_vm1, %v189_v34 }
  0x2f   : > { %762 = vmatmul.mubr.msk.f32.gmra.mrb[14].mxu1 %vm216_vm1, %v205_v35 }
  0xe5   : > { %v718_v37 = vpop.f32.mrb[0].mxu0 }
  0xe6   : > { %v742_v38 = vpop.f32.mrb[0].mxu1  ;;  %v389_v39 = vadd.f32 %v718_v37, %v902_v36  ;;  %v383_v41 = vpop.f32.mrb[1].mxu0 }
  0xe7   : > { %v469_v40 = vadd.f32 %v742_v38, %v902_v36  ;;  %v463_v42 = vpop.f32.mrb[1].mxu1  ;;  %v384_v43 = vadd.f32 %v902_v36, %v383_v41 }
  0xe8   : > { %v464_v44 = vadd.f32 %v902_v36, %v463_v42  ;;  %543 = vst.msk [vmem:[%s909_s29 + $0x8] sm:$0xff] %vm216_vm1, %v389_v39 }
  0xe9   : > { %559 = vst.msk [vmem:[%s909_s29 + $0x88] sm:$0xff] %vm216_vm1, %v469_v40  ;;  %542 = vst.msk [vmem:[%s909_s29] sm:$0xff] %vm216_vm1, %v384_v43  ;;  %v721_v45 = vpop.f32.mrb[2].mxu0 }
  0xea   : > { %558 = vst.msk [vmem:[%s909_s29 + $0x80] sm:$0xff] %vm216_vm1, %v464_v44  ;;  %v745_v46 = vpop.f32.mrb[2].mxu1  ;;  %v399_v47 = vadd.f32 %v721_v45, %v902_v36  ;;  %v393_v49 = vpop.f32.mrb[3].mxu0 }
  0xeb   : > { %v479_v48 = vadd.f32 %v745_v46, %v902_v36  ;;  %v473_v50 = vpop.f32.mrb[3].mxu1  ;;  %v394_v51 = vadd.f32 %v902_v36, %v393_v49 }
  0xec   : > { %v474_v52 = vadd.f32 %v902_v36, %v473_v50  ;;  %545 = vst.msk [vmem:[%s909_s29 + $0x18] sm:$0xff] %vm216_vm1, %v399_v47 }
  0xed   : > { %561 = vst.msk [vmem:[%s909_s29 + $0x98] sm:$0xff] %vm216_vm1, %v479_v48  ;;  %544 = vst.msk [vmem:[%s909_s29 + $0x10] sm:$0xff] %vm216_vm1, %v394_v51  ;;  %v724_v53 = vpop.f32.mrb[4].mxu0 }
  0xee   : > { %560 = vst.msk [vmem:[%s909_s29 + $0x90] sm:$0xff] %vm216_vm1, %v474_v52  ;;  %v748_v54 = vpop.f32.mrb[4].mxu1  ;;  %v409_v55 = vadd.f32 %v724_v53, %v902_v36  ;;  %v403_v57 = vpop.f32.mrb[5].mxu0 }
  0xef   : > { %v489_v56 = vadd.f32 %v748_v54, %v902_v36  ;;  %v483_v58 = vpop.f32.mrb[5].mxu1  ;;  %v404_v59 = vadd.f32 %v902_v36, %v403_v57 }
  0xf0   : > { %v484_v60 = vadd.f32 %v902_v36, %v483_v58  ;;  %547 = vst.msk [vmem:[%s909_s29 + $0x28] sm:$0xff] %vm216_vm1, %v409_v55 }
  0xf1   : > { %563 = vst.msk [vmem:[%s909_s29 + $0xa8] sm:$0xff] %vm216_vm1, %v489_v56  ;;  %546 = vst.msk [vmem:[%s909_s29 + $0x20] sm:$0xff] %vm216_vm1, %v404_v59  ;;  %v727_v61 = vpop.f32.mrb[6].mxu0 }
  0xf2   : > { %562 = vst.msk [vmem:[%s909_s29 + $0xa0] sm:$0xff] %vm216_vm1, %v484_v60  ;;  %v751_v62 = vpop.f32.mrb[6].mxu1  ;;  %v419_v63 = vadd.f32 %v727_v61, %v902_v36  ;;  %v413_v1 = vpop.f32.mrb[7].mxu0 }
  0xf3   : > { %v499_v0 = vadd.f32 %v751_v62, %v902_v36  ;;  %v493_v2 = vpop.f32.mrb[7].mxu1  ;;  %v414_v3 = vadd.f32 %v902_v36, %v413_v1 }
  0xf4   : > { %v494_v4 = vadd.f32 %v902_v36, %v493_v2  ;;  %549 = vst.msk [vmem:[%s909_s29 + $0x38] sm:$0xff] %vm216_vm1, %v419_v63 }
  0xf5   : > { %565 = vst.msk [vmem:[%s909_s29 + $0xb8] sm:$0xff] %vm216_vm1, %v499_v0  ;;  %548 = vst.msk [vmem:[%s909_s29 + $0x30] sm:$0xff] %vm216_vm1, %v414_v3  ;;  %v730_v5 = vpop.f32.mrb[8].mxu0 }
  0xf6   : > { %564 = vst.msk [vmem:[%s909_s29 + $0xb0] sm:$0xff] %vm216_vm1, %v494_v4  ;;  %v754_v6 = vpop.f32.mrb[8].mxu1  ;;  %v429_v7 = vadd.f32 %v730_v5, %v902_v36  ;;  %v423_v9 = vpop.f32.mrb[9].mxu0 }
  0xf7   : > { %v509_v8 = vadd.f32 %v754_v6, %v902_v36  ;;  %v503_v10 = vpop.f32.mrb[9].mxu1  ;;  %v424_v11 = vadd.f32 %v902_v36, %v423_v9 }
  0xf8   : > { %v504_v12 = vadd.f32 %v902_v36, %v503_v10  ;;  %551 = vst.msk [vmem:[%s909_s29 + $0x48] sm:$0xff] %vm216_vm1, %v429_v7 }
  0xf9   : > { %567 = vst.msk [vmem:[%s909_s29 + $0xc8] sm:$0xff] %vm216_vm1, %v509_v8  ;;  %550 = vst.msk [vmem:[%s909_s29 + $0x40] sm:$0xff] %vm216_vm1, %v424_v11  ;;  %v733_v13 = vpop.f32.mrb[10].mxu0 }
  0xfa   : > { %566 = vst.msk [vmem:[%s909_s29 + $0xc0] sm:$0xff] %vm216_vm1, %v504_v12  ;;  %v757_v14 = vpop.f32.mrb[10].mxu1  ;;  %v439_v15 = vadd.f32 %v733_v13, %v902_v36  ;;  %v433_v17 = vpop.f32.mrb[11].mxu0 }
  0xfb   : > { %v519_v16 = vadd.f32 %v757_v14, %v902_v36  ;;  %v513_v18 = vpop.f32.mrb[11].mxu1  ;;  %v434_v19 = vadd.f32 %v902_v36, %v433_v17 }
  0xfc   : > { %v514_v20 = vadd.f32 %v902_v36, %v513_v18  ;;  %553 = vst.msk [vmem:[%s909_s29 + $0x58] sm:$0xff] %vm216_vm1, %v439_v15 }
  0xfd   : > { %569 = vst.msk [vmem:[%s909_s29 + $0xd8] sm:$0xff] %vm216_vm1, %v519_v16  ;;  %552 = vst.msk [vmem:[%s909_s29 + $0x50] sm:$0xff] %vm216_vm1, %v434_v19  ;;  %v736_v21 = vpop.f32.mrb[12].mxu0 }
  0xfe   : > { %568 = vst.msk [vmem:[%s909_s29 + $0xd0] sm:$0xff] %vm216_vm1, %v514_v20  ;;  %v760_v22 = vpop.f32.mrb[12].mxu1  ;;  %v449_v23 = vadd.f32 %v736_v21, %v902_v36  ;;  %v443_v25 = vpop.f32.mrb[13].mxu0 }
  0xff   : > { %v529_v24 = vadd.f32 %v760_v22, %v902_v36  ;;  %v523_v26 = vpop.f32.mrb[13].mxu1  ;;  %v444_v27 = vadd.f32 %v902_v36, %v443_v25 }
 0x100   : > { %v524_v28 = vadd.f32 %v902_v36, %v523_v26  ;;  %555 = vst.msk [vmem:[%s909_s29 + $0x68] sm:$0xff] %vm216_vm1, %v449_v23 }
 0x101   : > { %571 = vst.msk [vmem:[%s909_s29 + $0xe8] sm:$0xff] %vm216_vm1, %v529_v24  ;;  %554 = vst.msk [vmem:[%s909_s29 + $0x60] sm:$0xff] %vm216_vm1, %v444_v27  ;;  %v739_v29 = vpop.f32.mrb[14].mxu0 }
 0x102   : > { %570 = vst.msk [vmem:[%s909_s29 + $0xe0] sm:$0xff] %vm216_vm1, %v524_v28  ;;  %v763_v30 = vpop.f32.mrb[14].mxu1  ;;  %v459_v31 = vadd.f32 %v739_v29, %v902_v36  ;;  %v453_v33 = vpop.f32.mrb[15].mxu0 }
 0x103   : > { %v539_v32 = vadd.f32 %v763_v30, %v902_v36  ;;  %v533_v34 = vpop.f32.mrb[15].mxu1  ;;  %v454_v35 = vadd.f32 %v902_v36, %v453_v33 }
 0x104   : > { %v534_v37 = vadd.f32 %v902_v36, %v533_v34  ;;  %557 = vst.msk [vmem:[%s909_s29 + $0x78] sm:$0xff] %vm216_vm1, %v459_v31 }
 0x105   : > { %573 = vst.msk [vmem:[%s909_s29 + $0xf8] sm:$0xff] %vm216_vm1, %v539_v32  ;;  %556 = vst.msk [vmem:[%s909_s29 + $0x70] sm:$0xff] %vm216_vm1, %v454_v35 }
 0x106   : > { %572 = vst.msk [vmem:[%s909_s29 + $0xf0] sm:$0xff] %vm216_vm1, %v534_v37 }
 0x107 PF: > { %s13_s12 = sadd.s32 1, %s786_s12  }
 0x108   : > { %p10_p4 = scmp.ge.s32.totalorder %s13_s12, 4  }
 0x10a   :  { %12 = sbr.rel (!%p10_p4) target bundleno = 1 (0x1), region = 62 }

</bundles_post_ra>
